<compile_context>
chip_gen: v7x
topology: tpu7x:2x2x1
jax: 0.10.0
libtpu: 0.0.40
codegen_flags: <defaults>
</compile_context>

<pallas_src>
import jax
import jax.numpy as jnp
from jax import lax
from jax.experimental import pallas as pl
from jax.experimental.pallas import tpu as pltpu

INPUT_SIZE = 1 * 28 * 28   # 784
NUM_CLASSES = 10


def _linear_kernel(x_ref, w_ref, b_ref, o_ref):
    # x_ref : (TB, K)  bfloat16, VMEM   (one batch tile)
    # w_ref : (N,  K)  bfloat16, VMEM   (PyTorch layout, resident across grid)
    # b_ref : (1,  N)  float32,  VMEM
    # o_ref : (TB, N)  float32,  VMEM
    acc = lax.dot_general(
        x_ref[...], w_ref[...],
        dimension_numbers=(((1,), (1,)), ((), ())),   # contract over K
        preferred_element_type=jnp.float32,
    )
    o_ref[...] = acc + b_ref[...]                      # bias add in f32


def _pick_tile_batch(batch):
    # Tile heights of 512-1024 rows reach ~85% of HBM roofline; 1024 rows of
    # bf16 x is ~1.6 MB per buffer, safe on v5e/v6e/v7x default scoped VMEM.
    if batch <= 1024:
        return batch            # block == full array dim: always legal
    return 1024                 # multiple of 8; last partial tile is masked


def logistic_model_forward(x, weight, bias):
    """y_hat = x @ weight.T + bias  (nn.Linear(784, 10) forward).

    x:      (B, INPUT_SIZE)            float32 (or bf16)
    weight: (NUM_CLASSES, INPUT_SIZE)  float32 (PyTorch layout, NOT transposed)
    bias:   (NUM_CLASSES,)             float32
    returns (B, NUM_CLASSES)           float32
    """
    B, K = x.shape
    N, K2 = weight.shape
    assert K == K2 and N == bias.shape[0]

    # bf16 inputs halve HBM traffic for the bandwidth-bound stream of x;
    # MXU takes bf16 natively with f32 accumulation.
    x_bf = x if x.dtype == jnp.bfloat16 else x.astype(jnp.bfloat16)
    w_bf = weight if weight.dtype == jnp.bfloat16 else weight.astype(jnp.bfloat16)
    b2 = bias.astype(jnp.float32).reshape(1, N)

    TB = _pick_tile_batch(B)
    grid = (pl.cdiv(B, TB),)

    cost = pl.CostEstimate(
        flops=2 * B * K * N,
        transcendentals=0,
        bytes_accessed=B * K * 2 + N * K * 2 + N * 4 + B * N * 4,
    )

    return pl.pallas_call(
        _linear_kernel,
        out_shape=jax.ShapeDtypeStruct((B, N), jnp.float32),
        grid=grid,
        in_specs=[
            pl.BlockSpec((TB, K), lambda i: (i, 0)),   # stream batch tiles
            pl.BlockSpec((N, K), lambda i: (0, 0)),    # weight resident
            pl.BlockSpec((1, N), lambda i: (0, 0)),    # bias resident
        ],
        out_specs=pl.BlockSpec((TB, N), lambda i: (i, 0)),
        compiler_params=pltpu.CompilerParams(
            dimension_semantics=("parallel",),         # megacore on v7x
        ),
        cost_estimate=cost,
    )(x_bf, w_bf, b2)


if __name__ == "__main__":
    key = jax.random.PRNGKey(0)
    kx, kw, kb = jax.random.split(key, 3)

    batch = 8
    # Deterministic parameter init mimicking nn.Linear's default
    # U(-1/sqrt(in_features), 1/sqrt(in_features)).
    bound = 1.0 / (INPUT_SIZE ** 0.5)
    weight = jax.random.uniform(
        kw, (NUM_CLASSES, INPUT_SIZE), jnp.float32, minval=-bound, maxval=bound)
    bias = jax.random.uniform(
        kb, (NUM_CLASSES,), jnp.float32, minval=-bound, maxval=bound)

    x = jax.random.normal(kx, (batch, INPUT_SIZE), jnp.float32)

    y = logistic_model_forward(x, weight, bias)
    y = jax.block_until_ready(y)
    assert y.shape == (batch, NUM_CLASSES)
    assert y.dtype == jnp.float32

    # Reference with identical dtype handling (bf16 inputs, f32 accumulate).
    y_ref_bf16 = jnp.dot(
        x.astype(jnp.bfloat16), weight.astype(jnp.bfloat16).T,
        preferred_element_type=jnp.float32) + bias
    assert jnp.allclose(y, y_ref_bf16, atol=1e-3, rtol=1e-3)

    # Loose sanity check against full-f32 nn.Linear math (bf16 input rounding).
    y_ref_f32 = x @ weight.T + bias
    assert jnp.allclose(y, y_ref_f32, atol=5e-2, rtol=5e-2)

    print("KERNEL_OK")
</pallas_src>

<mosaic_0001>
module attributes {stable_mosaic.version = 11 : i64} {
  func.func @_linear_kernel(%arg0: i32, %arg1: memref<8x784xbf16, #tpu.memory_space<vmem>>, %arg2: memref<10x784xbf16, #tpu.memory_space<vmem>>, %arg3: memref<1x10xf32, #tpu.memory_space<vmem>>, %arg4: memref<8x10xf32, #tpu.memory_space<vmem>>) attributes {dimension_semantics = [#tpu.dimension_semantics<parallel>], iteration_bounds = array<i64: 1>, scalar_prefetch = 0 : i64, scratch_operands = 0 : i64, tpu.core_type = #tpu.core_type<tc>, window_params = [{transform_indices = @transform_0, window_bounds = array<i64: 8, 784>}, {pipeline_mode = #tpu.pipeline_mode<synchronous>, transform_indices = @transform_1, window_bounds = array<i64: 10, 784>}, {pipeline_mode = #tpu.pipeline_mode<synchronous>, transform_indices = @transform_2, window_bounds = array<i64: 1, 10>}, {transform_indices = @transform_3, window_bounds = array<i64: 8, 10>}]} {
    %c0 = arith.constant 0 : index
    %c0_0 = arith.constant 0 : index
    %0 = vector.load %arg1[%c0, %c0_0] : memref<8x784xbf16, #tpu.memory_space<vmem>>, vector<8x784xbf16>
    %c0_1 = arith.constant 0 : index
    %c0_2 = arith.constant 0 : index
    %1 = vector.load %arg2[%c0_1, %c0_2] : memref<10x784xbf16, #tpu.memory_space<vmem>>, vector<10x784xbf16>
    %cst = arith.constant dense<0.000000e+00> : vector<8x10xf32>
    %2 = tpu.matmul %0, %1, %cst {dimension_numbers = #tpu.dot_dimension_numbers<[1], [1], [0], [0], [0, 0, 1, 0], [], []>} : vector<8x784xbf16>, vector<10x784xbf16>, vector<8x10xf32> -> vector<8x10xf32>
    %c0_3 = arith.constant 0 : index
    %c0_4 = arith.constant 0 : index
    %3 = vector.load %arg3[%c0_3, %c0_4] : memref<1x10xf32, #tpu.memory_space<vmem>>, vector<1x10xf32>
    %4 = vector.broadcast %3 : vector<1x10xf32> to vector<8x10xf32>
    %5 = arith.addf %2, %4 : vector<8x10xf32>
    %c0_5 = arith.constant 0 : index
    %c0_6 = arith.constant 0 : index
    %6 = vector.load %arg4[%c0_5, %c0_6] : memref<8x10xf32, #tpu.memory_space<vmem>>, vector<8x10xf32>
    tpu.vector_store %arg4[%c0_5, %c0_6], %5 {strides = array<i32>} : memref<8x10xf32, #tpu.memory_space<vmem>>, vector<8x10xf32>,
    return
  }
  func.func @transform_0(%arg0: i32) -> (i32, i32) {
    %c0_i32 = arith.constant 0 : i32
    %c0_i32_0 = arith.constant 0 : i32
    return %arg0, %c0_i32 : i32, i32
  }
  func.func @transform_1(%arg0: i32) -> (i32, i32) {
    %c0_i32 = arith.constant 0 : i32
    %c0_i32_0 = arith.constant 0 : i32
    %c0_i32_1 = arith.constant 0 : i32
    return %c0_i32, %c0_i32_0 : i32, i32
  }
  func.func @transform_2(%arg0: i32) -> (i32, i32) {
    %c0_i32 = arith.constant 0 : i32
    %c0_i32_0 = arith.constant 0 : i32
    %c0_i32_1 = arith.constant 0 : i32
    return %c0_i32, %c0_i32_0 : i32, i32
  }
  func.func @transform_3(%arg0: i32) -> (i32, i32) {
    %c0_i32 = arith.constant 0 : i32
    %c0_i32_0 = arith.constant 0 : i32
    return %arg0, %c0_i32 : i32, i32
  }
}

</mosaic_0001>

<bundles_post_ra>
// kernel: tpu_custom_call.1
= control target key start
LH: loop header
LB: loop body
LE: loop exit
PB: predicated region body
PF: predicated region fallthrough
CT: control target
= control target key end

     0   :  { %8 = vsyncpa [#allocation3], 0  ;;  %s510_s0 = inlined_call_operand.hbm [shape: bf16[8,784], index: 0, kind: input, shape index: {}]   ;;  %s511_s1 = inlined_call_operand.hbm [shape: bf16[10,784], index: 1, kind: input, shape index: {}]   ;;  %s512_s2 = inlined_call_operand.vmem [shape: f32[1,10], index: 2, kind: input, shape index: {}]   ;;  %s513_s3 = inlined_call_operand.hbm [shape: f32[8,10], index: 3, kind: output, shape index: {}]  }
   0x1   :  { %9 = vsyncpa [#allocation6], 0 }
   0x2   :  { %10 = vsyncpa [#allocation4], 0  ;;  %s435_s12 = smov [#allocation2]   ;;  %s436_s14 = smov [#allocation5]  }
   0x3   :  { %s17_s13 = sshll.u32 %s435_s12, 4  ;;  %s26_s15 = sshll.u32 %s436_s14, 4  ;;  %s18_s13 = int_to_ptr.vmem [resolvable:$true] %s17_s13  ;;  %s462_s15 = int_to_ptr.vmem [resolvable:$true] %s26_s15 }
   0x4   :  { %s363_s18 = scalar_lea.hbm %s510_s0, 448 }
   0x5   :  { %p364_p0 = scmp.ne.s32.totalorder %s510_s0, %s363_s18  ;;  %p367_p1 = scmp.lt.u32.totalorder %s363_s18, %s510_s0 }
   0x7   :  { %p369_p2 = pnand %p367_p1, %p364_p0 }
   0x9   :  { %372 = shalt.err (!%p369_p2)
}
   0xa   :  { %s373_s23 = scalar_lea.vmem %s18_s13, 448  ;;  %p378_p4 = scmp.lt.s32.totalorder %s18_s13, %s18_s13 }
   0xb   :  { %p374_p3 = scmp.ne.s32.totalorder %s18_s13, %s373_s23  ;;  %p379_p5 = scmp.lt.s32.totalorder %s373_s23, %s373_s23 }
   0xd   :  { %p380_p6 = por %p379_p5, %p378_p4 }
   0xf   :  { %p381_p7 = pnand %p380_p6, %p374_p3 }
  0x11   :  { %384 = shalt.err (!%p381_p7)
}
  0x12   :  { %20 = dma.hbm_to_vmem [thread:$0]  %s510_s0, 448, %s18_s13, [#allocation3]  }
  0x13   :  { %s385_s28 = scalar_lea.hbm %s511_s1, 896 }
  0x14   :  { %p386_p8 = scmp.ne.s32.totalorder %s511_s1, %s385_s28  ;;  %p389_p9 = scmp.lt.u32.totalorder %s385_s28, %s511_s1 }
  0x16   :  { %p391_p10 = pnand %p389_p9, %p386_p8 }
  0x18   :  { %394 = shalt.err (!%p391_p10)
}
  0x19   :  { %s395_s6 = scalar_lea.vmem %s462_s15, 896  ;;  %p400_p12 = scmp.lt.s32.totalorder %s462_s15, %s462_s15 }
  0x1a   :  { %p396_p11 = scmp.ne.s32.totalorder %s462_s15, %s395_s6  ;;  %p401_p13 = scmp.lt.s32.totalorder %s395_s6, %s395_s6 }
  0x1c   :  { %p402_p0 = por %p401_p13, %p400_p12 }
  0x1e   :  { %p403_p1 = pnand %p402_p0, %p396_p11 }
  0x20   :  { %406 = shalt.err (!%p403_p1)
}
  0x21   :  { %s437_s0 = smov 448   ;;  %s438_s7 = smov 28  }
  0x22   :  { %32 = dma.hbm_to_vmem [thread:$0]  %s511_s1, 896, %s462_s15, [#allocation6], %s437_s0, %s437_s0, %s438_s7  }
  0x23   :  { %429 = dma.done.wait [#allocation3], 448  }
  0x24   :  { %430 = vsyncadd [#allocation3], 4294966848 }
  0x25   :  { %431 = dma.done.wait [#allocation6], 896  }
  0x26   :  { %432 = vsyncadd [#allocation6], 4294966400  ;;  %v346_v0 = vld [vmem:[#allocation5 + $0x4] ss:$28 sps:$4 sm:$0x1f]   ;;  %v44_v5 = vld [vmem:[#allocation2 + $0x10] sm:$0xff] }
  0x27   :  { %v348_v1 = vld [vmem:[#allocation5 + $0x14] ss:$28 sps:$4 sm:$0x1f]   ;;  %127 = vmatprep.subr.bf16.mxu1 %v346_v0  ;;  %v350_v2 = vld [vmem:[#allocation5] ss:$28 sps:$4 sm:$0x1f]   ;;  %v311_v7 = vcombine.high %v44_v5, %v44_v5  ;;  %v310_v13 = vcombine.low %v44_v5, %v44_v5 }
  0x28   :  { %v351_v3 = vld [vmem:[#allocation5 + $0x10] ss:$28 sps:$4 sm:$0x1f]   ;;  %207 = vmatprep.subr.bf16.mxu0 %v348_v1  ;;  %v42_v4 = vld [vmem:[#allocation2] sm:$0xff]  ;;  %128 = vmatpush1.bf16.xpose.msra.mxu1 %v350_v2  ;;  %v439_v9 = vmov 0.0   ;;  %vm120_vm0 = vcmask 130048  }
  0x29   :  { %208 = vmatpush1.bf16.xpose.msra.mxu0 %v351_v3  ;;  %v307_v6 = vcombine.high %v42_v4, %v42_v4  ;;  %v358_v8 = vld [vmem:[#allocation5 + $0xc] ss:$28 sps:$4 sm:$0x1f]   ;;  %v359_v10 = vld [vmem:[#allocation5 + $0x18] ss:$28 sps:$4 sm:$0x1f]   ;;  %v306_v12 = vcombine.low %v42_v4, %v42_v4  ;;  %239 = vmatprep.mubr.bf16.mxu0 %v311_v7 }
  0x2a   :  { %323 = vmatprep.subr.bf16.mxu0 %v439_v9  ;;  %v43_v11 = vld [vmem:[#allocation2 + $0x8] sm:$0xff]  ;;  %167 = vmatprep.subr.bf16.mxu1 %v358_v8  ;;  %v356_v14 = vld [vmem:[#allocation5 + $0x8] ss:$28 sps:$4 sm:$0x1f]   ;;  %v125_v15 = vsel %vm120_vm0, %v359_v10, 0  ;;  %vm440_vm1 = vmmov 0  }
  0x2b   :  { %159 = vmatprep.mubr.bf16.mxu1 %v307_v6  ;;  %v309_v16 = vcombine.high %v43_v11, %v43_v11  ;;  %v308_v17 = vcombine.low %v43_v11, %v43_v11  ;;  %v362_v18 = vld [vmem:[#allocation2 + $0x18] ss:$0 sps:$4 sm:$0xff]   ;;  %v305_v19 = vld [vmem:[%s512_s2] ss:$0 sm:$0xff]  ;;  %s441_s11 = smov [#allocation7]   ;;  %vm287_vm2 = vcmask 80896  }
  0x2c   :  { %s295_s12 = sshll.u32 %s441_s11, 4  ;;  %s296_s12 = int_to_ptr.vmem [resolvable:$true] %s295_s12 }
  0x2d   :  { %s407_s13 = scalar_lea.vmem %s296_s12, 128  ;;  %p412_p3 = scmp.lt.s32.totalorder %s296_s12, %s296_s12 }
  0x2e   :  { %p408_p2 = scmp.ne.s32.totalorder %s296_s12, %s407_s13  ;;  %p413_p4 = scmp.lt.s32.totalorder %s407_s13, %s407_s13 }
  0x2f   :  { %160 = vmatmul.mubr.bf16.vlgmr.msra.gmra.mrb[0].mxu1 %v306_v12 }
  0x30   :  { %240 = vmatmul.mubr.bf16.vlgmr.msra.gmra.mrb[0].mxu0 %v310_v13  ;;  %168 = vmatpush1.bf16.xpose.msra.mxu1 %v356_v14  ;;  %p414_p5 = por %p413_p4, %p412_p3 }
  0x31   :  { %324 = vmatpush3.bf16.xpose.msra.mxu0 %v125_v15  ;;  %199 = vmatprep.mubr.bf16.mxu1 %v309_v16 }
  0x32   :  { %325 = vmatprep.mubr.msk.bf16.mxu0 %vm440_vm1, %v439_v9  ;;  %p415_p6 = pnand %p414_p5, %p408_p2 }
  0x3b   :  { %200 = vmatmul.mubr.bf16.vlgmr.msra.gmra.mrb[0].mxu1 %v308_v17 }
  0x3c   :  { %326 = vmatmul.mubr.msk.bf16.vlgmr.msra.gmra.mrb[0].mxu0 %vm120_vm0, %v362_v18 }
 0x10e   :  { %v201_v20 = vpop.f32.mrb[0].mxu1 }
 0x10f   :  { %v281_v21 = vpop.f32.mrb[0].mxu0  ;;  %v329_v22 = vadd.f32 %v305_v19, %v201_v20  ;;  %v203_v23 = vpop.f32.mrb[1].mxu1 }
 0x110   :  { %v327_v24 = vpop.f32.mrb[1].mxu0  ;;  %v204_v25 = vpop.f32.mrb[2].mxu1 }
 0x111   :  { %v284_v26 = vpop.f32.mrb[2].mxu0  ;;  %v330_v27 = vadd.f32 %v329_v22, %v281_v21  ;;  %v205_v28 = vpop.f32.mrb[3].mxu1 }
 0x112   :  { %v328_v29 = vpop.f32.mrb[3].mxu0 }
 0x113   :  { %288 = vst.msk [vmem:[#allocation7] sm:$0xff] %vm287_vm2, %v330_v27 }
 0x114   :  { %418 = shalt.err (!%p415_p6)
}
 0x115   :  { %s419_s15 = scalar_lea.hbm %s513_s3, 128 }
 0x116   :  { %p420_p7 = scmp.ne.s32.totalorder %s513_s3, %s419_s15  ;;  %p423_p8 = scmp.lt.u32.totalorder %s419_s15, %s513_s3 }
 0x118   :  { %p425_p9 = pnand %p423_p8, %p420_p7 }
 0x11a   :  { %428 = shalt.err (!%p425_p9)
}
 0x11b   :  { %298 = dma.vmem_to_hbm [thread:$0]  %s296_s12, 128, %s513_s3, [#allocation4]  }
 0x11c   :  { %433 = dma.done.wait [#allocation4], 128  }
 0x11d   :  { %434 = vsyncadd [#allocation4], 4294967168 }
 0x11e   :  { %302 = vsyncpa [#allocation3], 1 }
 0x11f   :  { %303 = vsyncpa [#allocation6], 1 }
 0x120   :  { %304 = vsyncpa [#allocation4], 1 }

</bundles_post_ra>
